<compile_context>
chip_gen: v5e
topology: v5e:2x2
jax: 0.10.0
libtpu: 0.0.40
codegen_flags: <defaults>
</compile_context>

<pallas_src>
import functools

import jax
import jax.numpy as jnp
from jax import lax
from jax.experimental import pallas as pl
from jax.experimental.pallas import tpu as pltpu


# Aligned column offset of the conv image inside the W-pooling scratch buffer.
# Column _OFF - 1 holds the -inf left pooling border; columns >= _OFF hold data.
_OFF = 8


def _tokenizer_kernel(patches_ref, w_ref, o_ref, hp_ref, *, hc, wc, cout, pool_k):
    """One batch element: conv-as-GEMM + fused 3x3 / stride-2 / pad-1 max pool."""
    hp_rows, wp_cols = hc // 2, wc // 2

    # ---- Conv2d (bias=False) as a single MXU GEMM: (Hc*Wc, k*k*Cin) @ (k*k*Cin, Cout).
    p = patches_ref[0]                                      # (Hc*Wc, K)
    w = w_ref[...]                                          # (K, Cout)
    y = jnp.dot(p, w, preferred_element_type=jnp.float32)   # (Hc*Wc, Cout) f32
    # activation=None -> Identity.

    # ---- MaxPool stage 1: pool along H (leading axis), window 3 / stride 2 / pad 1.
    y3 = y.reshape(hc, wc, cout)
    yr = y3.reshape(hp_rows, 2, wc, cout)                   # leading-dim split (free)
    even = yr[:, 0]                                         # conv rows 0, 2, 4, ...
    odd = yr[:, 1]                                          # conv rows 1, 3, 5, ...
    m01 = jnp.maximum(even, odd)                            # max(row 2r, row 2r+1)

    # Scratch gets -inf everywhere (covers the left border at col _OFF-1), then the
    # H-pooled rows land at an 8-aligned sublane offset.
    hp_ref[...] = jnp.full((hp_rows, _OFF + wc, cout), -jnp.inf, dtype=jnp.float32)
    hp_ref[0:1, _OFF:_OFF + wc, :] = m01[0:1]               # row -1 is the -inf pad
    hp_ref[1:hp_rows, _OFF:_OFF + wc, :] = jnp.maximum(m01[1:], odd[:-1])

    # ---- MaxPool stage 2: pool along W (sublane axis) via strided reads, stride 2.
    pooled = hp_ref[:, pl.ds(_OFF - 1, wp_cols, stride=2), :]          # kx = 0 tap
    for kx in range(1, pool_k):
        tap = hp_ref[:, pl.ds(_OFF - 1 + kx, wp_cols, stride=2), :]    # (Hp, Wp, Cout)
        pooled = jnp.maximum(pooled, tap)

    # ---- Flatten(2,3) + transpose(-2,-1): tokens row-major over (Hp, Wp), channels last.
    o_ref[0] = pooled.reshape(hp_rows * wp_cols, cout).astype(o_ref.dtype)


def tokenizer_pallas(x, conv_weight, *, stride=1, padding=1,
                     pooling_kernel_size=3, pooling_stride=2, pooling_padding=1):
    """Forward of se_cct.Tokenizer with its defaults: n_conv_layers=1,
    activation=None, max_pool=True, conv_bias=False.
    x: (B, Cin, H, W) NCHW.  conv_weight: (Cout, Cin, kh, kw)."""
    B, cin, H, W = x.shape
    cout, cin_w, kh, kw = conv_weight.shape
    assert cin == cin_w
    assert (pooling_kernel_size, pooling_stride, pooling_padding) == (3, 2, 1), (
        "kernel implements the module's default pooling config")
    # TODO(synk): n_conv_layers > 1 / non-default pooling configs would chain or
    # generalize this kernel; only the module defaults are implemented.

    hc = (H + 2 * padding - kh) // stride + 1
    wc = (W + 2 * padding - kw) // stride + 1
    assert hc % 2 == 0 and wc % 2 == 0
    hp_rows, wp_cols = hc // 2, wc // 2

    # ---- Wrapper-side layout plumbing (XLA): NCHW -> NHWC, zero pad, im2col,
    #      weight flatten.  Keeps the kernel to one big lane-dense GEMM per batch.
    x_nhwc = jnp.transpose(x, (0, 2, 3, 1))
    xp = jnp.pad(x_nhwc, ((0, 0), (padding, padding), (padding, padding), (0, 0)))
    taps = [xp[:, ky:ky + stride * (hc - 1) + 1:stride,
               kx:kx + stride * (wc - 1) + 1:stride, :]
            for ky in range(kh) for kx in range(kw)]
    patches = jnp.stack(taps, axis=3).reshape(B, hc * wc, kh * kw * cin)
    w2d = jnp.transpose(conv_weight, (2, 3, 1, 0)).reshape(kh * kw * cin, cout)

    kernel = functools.partial(_tokenizer_kernel, hc=hc, wc=wc, cout=cout,
                               pool_k=pooling_kernel_size)
    return pl.pallas_call(
        kernel,
        out_shape=jax.ShapeDtypeStruct((B, hp_rows * wp_cols, cout), x.dtype),
        grid_spec=pltpu.PrefetchScalarGridSpec(
            num_scalar_prefetch=0,
            grid=(B,),
            in_specs=[
                pl.BlockSpec((1, hc * wc, kh * kw * cin), lambda b: (b, 0, 0)),  # patches
                pl.BlockSpec((kh * kw * cin, cout), lambda b: (0, 0)),           # weights
            ],
            out_specs=pl.BlockSpec((1, hp_rows * wp_cols, cout), lambda b: (b, 0, 0)),
            scratch_shapes=[pltpu.VMEM((hp_rows, _OFF + wc, cout), jnp.float32)],
        ),
        compiler_params=pltpu.CompilerParams(
            dimension_semantics=("parallel",)),
    )(patches, w2d)


def tokenizer_reference(x, conv_weight, *, stride=1, padding=1):
    """Pure-JAX reference matching the PyTorch forward (eval mode)."""
    y = lax.conv_general_dilated(
        x, conv_weight, window_strides=(stride, stride),
        padding=((padding, padding), (padding, padding)),
        dimension_numbers=('NCHW', 'OIHW', 'NCHW'),
        precision=lax.Precision.HIGHEST)
    y = lax.reduce_window(y, -jnp.inf, lax.max,
                          window_dimensions=(1, 1, 3, 3),
                          window_strides=(1, 1, 2, 2),
                          padding=((0, 0), (0, 0), (1, 1), (1, 1)))
    B, C, Hp, Wp = y.shape
    return y.reshape(B, C, Hp * Wp).transpose(0, 2, 1)


if __name__ == "__main__":
    # Tokenizer(kernel_size=3, stride=1, padding=1, n_input_channels=3,
    #           n_output_channels=32) on a (2, 3, 16, 16) input.
    B, Cin, H, W = 2, 3, 16, 16
    Cout, K = 32, 3

    key = jax.random.PRNGKey(0)
    kx_, kw_ = jax.random.split(key)
    x = jax.random.normal(kx_, (B, Cin, H, W), dtype=jnp.float32)
    fan_in = Cin * K * K  # kaiming-normal-style scale (init is irrelevant to semantics)
    wconv = jax.random.normal(kw_, (Cout, Cin, K, K), dtype=jnp.float32) * (2.0 / fan_in) ** 0.5

    out = tokenizer_pallas(x, wconv, stride=1, padding=1)
    out = jax.block_until_ready(out)

    ref = tokenizer_reference(x, wconv, stride=1, padding=1)
    assert out.shape == (B, (H // 2) * (W // 2), Cout), out.shape
    assert jnp.allclose(out, ref, atol=1e-3, rtol=1e-3), float(jnp.max(jnp.abs(out - ref)))

    print("KERNEL_OK")
</pallas_src>

<mosaic_0001>
module attributes {stable_mosaic.version = 11 : i64} {
  func.func @_tokenizer_kernel(%arg0: i32, %arg1: memref<1x256x27xf32, #tpu.memory_space<vmem>>, %arg2: memref<27x32xf32, #tpu.memory_space<vmem>>, %arg3: memref<1x64x32xf32, #tpu.memory_space<vmem>>, %arg4: memref<8x24x32xf32, #tpu.memory_space<vmem>>) attributes {dimension_semantics = [#tpu.dimension_semantics<parallel>], iteration_bounds = array<i64: 2>, scalar_prefetch = 0 : i64, scratch_operands = 1 : i64, tpu.core_type = #tpu.core_type<tc>, window_params = [{transform_indices = @transform_0, window_bounds = array<i64: 1, 256, 27>}, {pipeline_mode = #tpu.pipeline_mode<synchronous>, transform_indices = @transform_1, window_bounds = array<i64: 27, 32>}, {transform_indices = @transform_2, window_bounds = array<i64: 1, 64, 32>}]} {
    %c0 = arith.constant 0 : index
    %c0_0 = arith.constant 0 : index
    %c0_1 = arith.constant 0 : index
    %0 = vector.load %arg1[%c0, %c0_0, %c0_1] : memref<1x256x27xf32, #tpu.memory_space<vmem>>, vector<1x256x27xf32>
    %1 = vector.shape_cast %0 : vector<1x256x27xf32> to vector<256x27xf32>
    %c0_2 = arith.constant 0 : index
    %c0_3 = arith.constant 0 : index
    %2 = vector.load %arg2[%c0_2, %c0_3] : memref<27x32xf32, #tpu.memory_space<vmem>>, vector<27x32xf32>
    %cst = arith.constant dense<0.000000e+00> : vector<256x32xf32>
    %3 = tpu.matmul %1, %2, %cst {dimension_numbers = #tpu.dot_dimension_numbers<[1], [0], [0], [1], [0, 0, 1, 1], [], []>} : vector<256x27xf32>, vector<27x32xf32>, vector<256x32xf32> -> vector<256x32xf32>
    %4 = vector.shape_cast %3 : vector<256x32xf32> to vector<16x16x32xf32>
    %5 = vector.shape_cast %4 : vector<16x16x32xf32> to vector<8x2x16x32xf32>
    %6 = vector.extract_strided_slice %5 {offsets = [0, 0, 0, 0], sizes = [8, 1, 16, 32], strides = [1, 1, 1, 1]} : vector<8x2x16x32xf32> to vector<8x1x16x32xf32>
    %7 = vector.shape_cast %6 : vector<8x1x16x32xf32> to vector<8x16x32xf32>
    %8 = vector.extract_strided_slice %5 {offsets = [0, 1, 0, 0], sizes = [8, 1, 16, 32], strides = [1, 1, 1, 1]} : vector<8x2x16x32xf32> to vector<8x1x16x32xf32>
    %9 = vector.shape_cast %8 : vector<8x1x16x32xf32> to vector<8x16x32xf32>
    %10 = arith.maximumf %7, %9 : vector<8x16x32xf32>
    %cst_4 = arith.constant 0xFF800000 : f32
    %11 = vector.broadcast %cst_4 : f32 to vector<8x24x32xf32>
    %c0_5 = arith.constant 0 : index
    %c0_6 = arith.constant 0 : index
    %c0_7 = arith.constant 0 : index
    %12 = vector.load %arg4[%c0_5, %c0_6, %c0_7] : memref<8x24x32xf32, #tpu.memory_space<vmem>>, vector<8x24x32xf32>
    tpu.vector_store %arg4[%c0_5, %c0_6, %c0_7], %11 {strides = array<i32>} : memref<8x24x32xf32, #tpu.memory_space<vmem>>, vector<8x24x32xf32>,
    %13 = vector.extract_strided_slice %10 {offsets = [0, 0, 0], sizes = [1, 16, 32], strides = [1, 1, 1]} : vector<8x16x32xf32> to vector<1x16x32xf32>
    %c0_8 = arith.constant 0 : index
    %c8 = arith.constant 8 : index
    %c0_9 = arith.constant 0 : index
    %14 = vector.load %arg4[%c0_8, %c8, %c0_9] : memref<8x24x32xf32, #tpu.memory_space<vmem>>, vector<1x16x32xf32>
    tpu.vector_store %arg4[%c0_8, %c8, %c0_9], %13 {strides = array<i32>} : memref<8x24x32xf32, #tpu.memory_space<vmem>>, vector<1x16x32xf32>,
    %15 = vector.extract_strided_slice %10 {offsets = [1, 0, 0], sizes = [7, 16, 32], strides = [1, 1, 1]} : vector<8x16x32xf32> to vector<7x16x32xf32>
    %16 = vector.extract_strided_slice %9 {offsets = [0, 0, 0], sizes = [7, 16, 32], strides = [1, 1, 1]} : vector<8x16x32xf32> to vector<7x16x32xf32>
    %17 = arith.maximumf %15, %16 : vector<7x16x32xf32>
    %c1 = arith.constant 1 : index
    %c8_10 = arith.constant 8 : index
    %c0_11 = arith.constant 0 : index
    %18 = vector.load %arg4[%c1, %c8_10, %c0_11] : memref<8x24x32xf32, #tpu.memory_space<vmem>>, vector<7x16x32xf32>
    tpu.vector_store %arg4[%c1, %c8_10, %c0_11], %17 {strides = array<i32>} : memref<8x24x32xf32, #tpu.memory_space<vmem>>, vector<7x16x32xf32>,
    %c0_12 = arith.constant 0 : index
    %c7 = arith.constant 7 : index
    %c0_13 = arith.constant 0 : index
    %19 = tpu.strided_load %arg4[%c0_12, %c7, %c0_13] {strides = array<i32: 1, 2, 1>} : memref<8x24x32xf32, #tpu.memory_space<vmem>>, vector<8x8x32xf32>
    %c0_14 = arith.constant 0 : index
    %c8_15 = arith.constant 8 : index
    %c0_16 = arith.constant 0 : index
    %20 = tpu.strided_load %arg4[%c0_14, %c8_15, %c0_16] {strides = array<i32: 1, 2, 1>} : memref<8x24x32xf32, #tpu.memory_space<vmem>>, vector<8x8x32xf32>
    %21 = arith.maximumf %19, %20 : vector<8x8x32xf32>
    %c0_17 = arith.constant 0 : index
    %c9 = arith.constant 9 : index
    %c0_18 = arith.constant 0 : index
    %22 = tpu.strided_load %arg4[%c0_17, %c9, %c0_18] {strides = array<i32: 1, 2, 1>} : memref<8x24x32xf32, #tpu.memory_space<vmem>>, vector<8x8x32xf32>
    %23 = arith.maximumf %21, %22 : vector<8x8x32xf32>
    %24 = vector.shape_cast %23 : vector<8x8x32xf32> to vector<64x32xf32>
    %c0_19 = arith.constant 0 : index
    %c0_20 = arith.constant 0 : index
    %c0_21 = arith.constant 0 : index
    %25 = vector.load %arg3[%c0_19, %c0_20, %c0_21] : memref<1x64x32xf32, #tpu.memory_space<vmem>>, vector<1x64x32xf32>
    %26 = vector.shape_cast %25 : vector<1x64x32xf32> to vector<64x32xf32>
    %27 = vector.shape_cast %24 : vector<64x32xf32> to vector<1x64x32xf32>
    tpu.vector_store %arg3[%c0_19, %c0_20, %c0_21], %27 {strides = array<i32>} : memref<1x64x32xf32, #tpu.memory_space<vmem>>, vector<1x64x32xf32>,
    return
  }
  func.func @transform_0(%arg0: i32) -> (i32, i32, i32) {
    %c0_i32 = arith.constant 0 : i32
    %c0_i32_0 = arith.constant 0 : i32
    %c0_i32_1 = arith.constant 0 : i32
    return %arg0, %c0_i32, %c0_i32_0 : i32, i32, i32
  }
  func.func @transform_1(%arg0: i32) -> (i32, i32) {
    %c0_i32 = arith.constant 0 : i32
    %c0_i32_0 = arith.constant 0 : i32
    %c0_i32_1 = arith.constant 0 : i32
    return %c0_i32, %c0_i32_0 : i32, i32
  }
  func.func @transform_2(%arg0: i32) -> (i32, i32, i32) {
    %c0_i32 = arith.constant 0 : i32
    %c0_i32_0 = arith.constant 0 : i32
    %c0_i32_1 = arith.constant 0 : i32
    return %arg0, %c0_i32, %c0_i32_0 : i32, i32, i32
  }
}

</mosaic_0001>

<bundles_post_ra>
// kernel: tpu_custom_call.1
= control target key start
LH: loop header
LB: loop body
LE: loop exit
PB: predicated region body
PF: predicated region fallthrough
CT: control target
= control target key end

     0   :  { %s684_s9 = smov 0   ;;  %s855_s0 = inlined_call_operand.vmem [shape: f32[2,256,27], index: 0, kind: input, shape index: {}]   ;;  %s856_s1 = inlined_call_operand.vmem [shape: f32[27,32], index: 1, kind: input, shape index: {}]   ;;  %s857_s2 = inlined_call_operand.vmem [shape: f32[2,64,32], index: 2, kind: output, shape index: {}]  }
   0x1 LB: > { %s593_s10 = sadd.s32 4294967295, %s666_s9   ;;  %p597_p0 = scmp.ge.s32.totalorder %s666_s9, 1  ;;  %s666_s9 = sphi %s684_s9, %s12_s9  }
   0x2   : > { %p112_p1 = scmp.lt.s32.totalorder %s666_s9, 3 }
   0x4   : > { %p113_p2 = pnand %p597_p0, %p112_p1 }
   0x5   : > { %p134_p3 = scmp.lt.s32.totalorder (!%p113_p2), %s593_s10, 1 }
   0x6   : > { %116 = sbr.rel (%p113_p2) target bundleno = 228 (0xe4), region = 28 }
   0xb   : > { %v179_v0 = vld [vmem:[%s856_s1 + $0x18] sm:$0x7]  ;;  %vm277_vm0 = vcmask 1042432   ;;  %v178_v1 = vld [vmem:[%s856_s1 + $0x10] sm:$0xff]  ;;  %v177_v2 = vld [vmem:[%s856_s1 + $0x8] sm:$0xff]  ;;  %s859_s10 = smov (!%p134_p3, %s593_s10), 1 }
   0xc   : > { %602 = vmatpush.msk.msra.mxu0 %vm277_vm0, %v179_v0  ;;  %639 = vmatpush.msk.msra.mxu1 %vm277_vm0, %v179_v0  ;;  %v176_v3 = vld [vmem:[%s856_s1] sm:$0xff]  ;;  %s637_s19 = sshll.u32 %s859_s10, 8  ;;  %vm180_vm1 = vcmask 220160   ;;  %vm410_vm2 = vcmask 261120   ;;  %v668_v36 = vmov -inf   ;;  %s638_s23 = sshll.u32 %s859_s10, 6 }
   0xd   : > { %640 = vmatpush.msk.msra.mxu2 %vm277_vm0, %v179_v0  ;;  %641 = vmatpush.msk.msra.mxu3 %vm277_vm0, %v179_v0  ;;  %s710_s22 = scalar_lea.vmem %s855_s0, %s637_s19  ;;  %412 = vst.msk [vmem:[#allocation2 + $0x8] sm:$0xff] %vm410_vm2, %v668_v36  ;;  %s814_s26 = scalar_lea.vmem %s857_s2, %s638_s23 }
   0xe   : > { %294 = vmatpush.msra.mxu0 %v178_v1  ;;  %642 = vmatpush.msra.mxu1 %v178_v1  ;;  %v144_v4 = vld [vmem:[%s710_s22] sm:$0xff]  ;;  %v145_v8 = vld [vmem:[%s710_s22 + $0x8] sm:$0xff]  ;;  %v146_v12 = vld [vmem:[%s710_s22 + $0x10] sm:$0xff]  ;;  %411 = vst.msk [vmem:[#allocation2] sm:$0xff] %vm410_vm2, %v668_v36 }
   0xf   : > { %643 = vmatpush.msra.mxu2 %v178_v1  ;;  %644 = vmatpush.msra.mxu3 %v178_v1  ;;  %v152_v5 = vld [vmem:[%s710_s22 + $0x40] sm:$0xff]  ;;  %v153_v9 = vld [vmem:[%s710_s22 + $0x48] sm:$0xff]  ;;  %v154_v13 = vld [vmem:[%s710_s22 + $0x50] sm:$0xff]  ;;  %413 = vst.msk [vmem:[#allocation2 + $0x10] sm:$0xff] %vm410_vm2, %v668_v36 }
  0x10   : > { %295 = vmatpush.msra.mxu0 %v177_v2  ;;  %645 = vmatpush.msra.mxu1 %v177_v2  ;;  %v160_v6 = vld [vmem:[%s710_s22 + $0x80] sm:$0xff]  ;;  %v161_v10 = vld [vmem:[%s710_s22 + $0x88] sm:$0xff]  ;;  %v162_v14 = vld [vmem:[%s710_s22 + $0x90] sm:$0xff]  ;;  %414 = vst.msk [vmem:[#allocation2 + $0x18] sm:$0xff] %vm410_vm2, %v668_v36 }
  0x11   : > { %646 = vmatpush.msra.mxu2 %v177_v2  ;;  %647 = vmatpush.msra.mxu3 %v177_v2  ;;  %v168_v7 = vld [vmem:[%s710_s22 + $0xc0] sm:$0xff]  ;;  %v169_v11 = vld [vmem:[%s710_s22 + $0xc8] sm:$0xff]  ;;  %v170_v15 = vld [vmem:[%s710_s22 + $0xd0] sm:$0xff]  ;;  %415 = vst.msk [vmem:[#allocation2 + $0x20] sm:$0xff] %vm410_vm2, %v668_v36 }
  0x12   : > { %296 = vmatpush.msra.mxu0 %v176_v3  ;;  %648 = vmatpush.msra.mxu1 %v176_v3  ;;  %v147_v16 = vld [vmem:[%s710_s22 + $0x18] sm:$0xff]  ;;  %v148_v20 = vld [vmem:[%s710_s22 + $0x20] sm:$0xff]  ;;  %v149_v24 = vld [vmem:[%s710_s22 + $0x28] sm:$0xff]  ;;  %416 = vst.msk [vmem:[#allocation2 + $0x28] sm:$0xff] %vm410_vm2, %v668_v36 }
  0x13   : > { %649 = vmatpush.msra.mxu2 %v176_v3  ;;  %650 = vmatpush.msra.mxu3 %v176_v3  ;;  %v155_v17 = vld [vmem:[%s710_s22 + $0x58] sm:$0xff]  ;;  %v156_v21 = vld [vmem:[%s710_s22 + $0x60] sm:$0xff]  ;;  %v157_v25 = vld [vmem:[%s710_s22 + $0x68] sm:$0xff]  ;;  %417 = vst.msk [vmem:[#allocation2 + $0x30] sm:$0xff] %vm410_vm2, %v668_v36 }
  0x14   : > { %603 = vmatmul.msk.f32.vlgmr.msra.gmra.mxu0 %vm180_vm1, %v144_v4  ;;  %611 = vmatmul.msk.f32.vlgmr.msra.gmra.mxu1 %vm180_vm1, %v152_v5  ;;  %v163_v18 = vld [vmem:[%s710_s22 + $0x98] sm:$0xff]  ;;  %v164_v22 = vld [vmem:[%s710_s22 + $0xa0] sm:$0xff]  ;;  %v165_v26 = vld [vmem:[%s710_s22 + $0xa8] sm:$0xff]  ;;  %418 = vst.msk [vmem:[#allocation2 + $0x38] sm:$0xff] %vm410_vm2, %v668_v36 }
  0x15   : > { %619 = vmatmul.msk.f32.vlgmr.msra.gmra.mxu2 %vm180_vm1, %v160_v6  ;;  %627 = vmatmul.msk.f32.vlgmr.msra.gmra.mxu3 %vm180_vm1, %v168_v7  ;;  %v171_v19 = vld [vmem:[%s710_s22 + $0xd8] sm:$0xff]  ;;  %v172_v23 = vld [vmem:[%s710_s22 + $0xe0] sm:$0xff]  ;;  %v173_v27 = vld [vmem:[%s710_s22 + $0xe8] sm:$0xff]  ;;  %419 = vst.msk [vmem:[#allocation2 + $0x40] sm:$0xff] %vm410_vm2, %v668_v36 }
  0x16   : > { %v150_v28 = vld [vmem:[%s710_s22 + $0x30] sm:$0xff]  ;;  %v151_v32 = vld [vmem:[%s710_s22 + $0x38] sm:$0xff]  ;;  %420 = vst.msk [vmem:[#allocation2 + $0x48] sm:$0xff] %vm410_vm2, %v668_v36 }
  0x17   : > { %v158_v29 = vld [vmem:[%s710_s22 + $0x70] sm:$0xff]  ;;  %v159_v33 = vld [vmem:[%s710_s22 + $0x78] sm:$0xff]  ;;  %421 = vst.msk [vmem:[#allocation2 + $0x50] sm:$0xff] %vm410_vm2, %v668_v36 }
  0x18   : > { %v166_v30 = vld [vmem:[%s710_s22 + $0xb0] sm:$0xff]  ;;  %v167_v34 = vld [vmem:[%s710_s22 + $0xb8] sm:$0xff]  ;;  %422 = vst.msk [vmem:[#allocation2 + $0x58] sm:$0xff] %vm410_vm2, %v668_v36 }
  0x19   : > { %v174_v31 = vld [vmem:[%s710_s22 + $0xf0] sm:$0xff]  ;;  %v175_v35 = vld [vmem:[%s710_s22 + $0xf8] sm:$0xff]  ;;  %423 = vst.msk [vmem:[#allocation2 + $0x60] sm:$0xff] %vm410_vm2, %v668_v36 }
  0x1a   : > { %424 = vst.msk [vmem:[#allocation2 + $0x68] sm:$0xff] %vm410_vm2, %v668_v36 }
  0x1b   : > { %425 = vst.msk [vmem:[#allocation2 + $0x70] sm:$0xff] %vm410_vm2, %v668_v36 }
  0x1c   : > { %604 = vmatmul.msk.f32.gmra.mxu0 %vm180_vm1, %v145_v8  ;;  %612 = vmatmul.msk.f32.gmra.mxu1 %vm180_vm1, %v153_v9  ;;  %426 = vst.msk [vmem:[#allocation2 + $0x78] sm:$0xff] %vm410_vm2, %v668_v36 }
  0x1d   : > { %620 = vmatmul.msk.f32.gmra.mxu2 %vm180_vm1, %v161_v10  ;;  %628 = vmatmul.msk.f32.gmra.mxu3 %vm180_vm1, %v169_v11  ;;  %427 = vst.msk [vmem:[#allocation2 + $0x80] sm:$0xff] %vm410_vm2, %v668_v36 }
  0x1e   : > { %428 = vst.msk [vmem:[#allocation2 + $0x88] sm:$0xff] %vm410_vm2, %v668_v36 }
  0x1f   : > { %429 = vst.msk [vmem:[#allocation2 + $0x90] sm:$0xff] %vm410_vm2, %v668_v36 }
  0x20   : > { %430 = vst.msk [vmem:[#allocation2 + $0x98] sm:$0xff] %vm410_vm2, %v668_v36 }
  0x21   : > { %431 = vst.msk [vmem:[#allocation2 + $0xa0] sm:$0xff] %vm410_vm2, %v668_v36 }
  0x22   : > { %432 = vst.msk [vmem:[#allocation2 + $0xa8] sm:$0xff] %vm410_vm2, %v668_v36 }
  0x23   : > { %433 = vst.msk [vmem:[#allocation2 + $0xb0] sm:$0xff] %vm410_vm2, %v668_v36 }
  0x24   : > { %605 = vmatmul.msk.f32.gmra.mxu0 %vm180_vm1, %v146_v12  ;;  %613 = vmatmul.msk.f32.gmra.mxu1 %vm180_vm1, %v154_v13  ;;  %434 = vst.msk [vmem:[#allocation2 + $0xb8] sm:$0xff] %vm410_vm2, %v668_v36 }
  0x25   : > { %621 = vmatmul.msk.f32.gmra.mxu2 %vm180_vm1, %v162_v14  ;;  %629 = vmatmul.msk.f32.gmra.mxu3 %vm180_vm1, %v170_v15 }
  0x2c   : > { %606 = vmatmul.msk.f32.gmra.mxu0 %vm180_vm1, %v147_v16  ;;  %614 = vmatmul.msk.f32.gmra.mxu1 %vm180_vm1, %v155_v17 }
  0x2d   : > { %622 = vmatmul.msk.f32.gmra.mxu2 %vm180_vm1, %v163_v18  ;;  %630 = vmatmul.msk.f32.gmra.mxu3 %vm180_vm1, %v171_v19 }
  0x34   : > { %607 = vmatmul.msk.f32.gmra.mxu0 %vm180_vm1, %v148_v20  ;;  %615 = vmatmul.msk.f32.gmra.mxu1 %vm180_vm1, %v156_v21 }
  0x35   : > { %623 = vmatmul.msk.f32.gmra.mxu2 %vm180_vm1, %v164_v22  ;;  %631 = vmatmul.msk.f32.gmra.mxu3 %vm180_vm1, %v172_v23 }
  0x3c   : > { %608 = vmatmul.msk.f32.gmra.mxu0 %vm180_vm1, %v149_v24  ;;  %616 = vmatmul.msk.f32.gmra.mxu1 %vm180_vm1, %v157_v25 }
  0x3d   : > { %624 = vmatmul.msk.f32.gmra.mxu2 %vm180_vm1, %v165_v26  ;;  %632 = vmatmul.msk.f32.gmra.mxu3 %vm180_vm1, %v173_v27 }
  0x44   : > { %609 = vmatmul.msk.f32.gmra.mxu0 %vm180_vm1, %v150_v28  ;;  %617 = vmatmul.msk.f32.gmra.mxu1 %vm180_vm1, %v158_v29 }
  0x45   : > { %625 = vmatmul.msk.f32.gmra.mxu2 %vm180_vm1, %v166_v30  ;;  %633 = vmatmul.msk.f32.gmra.mxu3 %vm180_vm1, %v174_v31 }
  0x4c   : > { %610 = vmatmul.msk.f32.gmra.mxu0 %vm180_vm1, %v151_v32  ;;  %618 = vmatmul.msk.f32.gmra.mxu1 %vm180_vm1, %v159_v33 }
  0x4d   : > { %626 = vmatmul.msk.f32.gmra.mxu2 %vm180_vm1, %v167_v34  ;;  %634 = vmatmul.msk.f32.gmra.mxu3 %vm180_vm1, %v175_v35 }
  0x91   : > { %v298_v37 = vpop.f32.mrf.mxu0  ;;  %v322_v38 = vpop.f32.mrf.mxu1 }
  0x98   : > { %v346_v39 = vpop.f32.mrf.mxu2  ;;  %v370_v40 = vpop.f32.mrf.mxu3 }
  0x99   : > { %v301_v41 = vpop.f32.mrf.mxu0  ;;  %v325_v42 = vpop.f32.mrf.mxu1 }
  0xa0   : > { %v800_v43 = vpop.f32.mrf.mxu2  ;;  %v802_v44 = vpop.f32.mrf.mxu3 }
  0xa1   : > { %v304_v45 = vpop.f32.mrf.mxu0  ;;  %v328_v46 = vpop.f32.mrf.mxu1 }
  0xa2   : > { %v394_v47 = vmax.f32 %v298_v37, %v304_v45  ;;  %v398_v2 = vmax.f32 %v322_v38, %v328_v46 }
  0xa4   : > { %435 = vst.msk [vmem:[#allocation2 + $0x8] sm:$0xff] %vm410_vm2, %v394_v47 }
  0xa8   : > { %v352_v48 = vpop.f32.mrf.mxu2  ;;  %v376_v49 = vpop.f32.mrf.mxu3 }
  0xa9   : > { %v307_v50 = vpop.f32.mrf.mxu0  ;;  %v331_v51 = vpop.f32.mrf.mxu1  ;;  %v402_v3 = vmax.f32 %v346_v39, %v352_v48  ;;  %v406_v14 = vmax.f32 %v370_v40, %v376_v49 }
  0xaa   : > { %v395_v52 = vmax.f32 %v301_v41, %v307_v50  ;;  %v399_v15 = vmax.f32 %v325_v42, %v331_v51 }
  0xac   : > { %436 = vst.msk [vmem:[#allocation2 + $0x10] sm:$0xff] %vm410_vm2, %v395_v52 }
  0xb0   : > { %v806_v53 = vpop.f32.mrf.mxu2  ;;  %v808_v54 = vpop.f32.mrf.mxu3 }
  0xb1   : > { %v310_v55 = vpop.f32.mrf.mxu0  ;;  %v334_v56 = vpop.f32.mrf.mxu1  ;;  %v403_v26 = vmax.f32 %v800_v43, %v806_v53  ;;  %v407_v32 = vmax.f32 %v802_v44, %v808_v54 }
  0xb3   : > { %v467_v57 = vld [vmem:[#allocation2 + $0x7] ss:$2 sm:$0xff]  ;;  %v483_v58 = vld [vmem:[#allocation2 + $0x8] ss:$2 sm:$0xff] }
  0xb4   : > { %v498_v59 = vmax.f32 %v467_v57, %v483_v58  ;;  %v507_v60 = vld [vmem:[#allocation2 + $0x9] ss:$2 sm:$0xff] }
  0xb6   : > { %v522_v61 = vmax.f32 %v498_v59, %v507_v60 }
  0xb8   : > { %530 = vst.msk [vmem:[%s814_s26] sm:$0xff] %vm410_vm2, %v522_v61  ;;  %v358_v62 = vpop.f32.mrf.mxu2  ;;  %v382_v63 = vpop.f32.mrf.mxu3 }
  0xb9   : > { %v313_v0 = vpop.f32.mrf.mxu0  ;;  %v337_v1 = vpop.f32.mrf.mxu1 }
  0xc0   : > { %v361_v4 = vpop.f32.mrf.mxu2  ;;  %v385_v5 = vpop.f32.mrf.mxu3 }
  0xc1   : > { %v316_v6 = vpop.f32.mrf.mxu0  ;;  %v340_v7 = vpop.f32.mrf.mxu1 }
  0xc2   : > { %v396_v8 = vmax.f32 %v310_v55, %v316_v6  ;;  %v439_v9 = vmax.f32 %v398_v2, %v316_v6  ;;  %v400_v10 = vmax.f32 %v334_v56, %v340_v7  ;;  %v443_v11 = vmax.f32 %v402_v3, %v340_v7 }
  0xc4   : > { %v437_v12 = vmax.f32 %v396_v8, %v304_v45  ;;  %454 = vst.msk [vmem:[#allocation2 + $0x38] sm:$0xff] %vm410_vm2, %v439_v9  ;;  %v441_v13 = vmax.f32 %v400_v10, %v328_v46 }
  0xc5   : > { %458 = vst.msk [vmem:[#allocation2 + $0x68] sm:$0xff] %vm410_vm2, %v443_v11 }
  0xc6   : > { %452 = vst.msk [vmem:[#allocation2 + $0x20] sm:$0xff] %vm410_vm2, %v437_v12 }
  0xc7   : > { %456 = vst.msk [vmem:[#allocation2 + $0x50] sm:$0xff] %vm410_vm2, %v441_v13 }
  0xc8   : > { %v364_v16 = vpop.f32.mrf.mxu2  ;;  %v388_v17 = vpop.f32.mrf.mxu3 }
  0xc9   : > { %v404_v18 = vmax.f32 %v358_v62, %v364_v16  ;;  %v447_v19 = vmax.f32 %v406_v14, %v364_v16  ;;  %v408_v20 = vmax.f32 %v382_v63, %v388_v17  ;;  %v319_v21 = vpop.f32.mrf.mxu0  ;;  %v343_v22 = vpop.f32.mrf.mxu1 }
  0xca   : > { %v397_v23 = vmax.f32 %v313_v0, %v319_v21  ;;  %v440_v24 = vmax.f32 %v399_v15, %v319_v21  ;;  %v401_v25 = vmax.f32 %v337_v1, %v343_v22  ;;  %v444_v31 = vmax.f32 %v403_v26, %v343_v22 }
  0xcb   : > { %v445_v27 = vmax.f32 %v404_v18, %v352_v48  ;;  %462 = vst.msk [vmem:[#allocation2 + $0x98] sm:$0xff] %vm410_vm2, %v447_v19  ;;  %v449_v28 = vmax.f32 %v408_v20, %v376_v49 }
  0xcc   : > { %v438_v29 = vmax.f32 %v397_v23, %v307_v50  ;;  %455 = vst.msk [vmem:[#allocation2 + $0x40] sm:$0xff] %vm410_vm2, %v440_v24  ;;  %v442_v30 = vmax.f32 %v401_v25, %v331_v51 }
  0xcd   : > { %460 = vst.msk [vmem:[#allocation2 + $0x80] sm:$0xff] %vm410_vm2, %v445_v27 }
  0xce   : > { %464 = vst.msk [vmem:[#allocation2 + $0xb0] sm:$0xff] %vm410_vm2, %v449_v28 }
  0xcf   : > { %453 = vst.msk [vmem:[#allocation2 + $0x28] sm:$0xff] %vm410_vm2, %v438_v29 }
  0xd0   : > { %457 = vst.msk [vmem:[#allocation2 + $0x58] sm:$0xff] %vm410_vm2, %v442_v30  ;;  %v367_v33 = vpop.f32.mrf.mxu2  ;;  %v391_v34 = vpop.f32.mrf.mxu3 }
  0xd1   : > { %459 = vst.msk [vmem:[#allocation2 + $0x70] sm:$0xff] %vm410_vm2, %v444_v31  ;;  %v405_v35 = vmax.f32 %v361_v4, %v367_v33  ;;  %v448_v36 = vmax.f32 %v407_v32, %v367_v33  ;;  %v409_v37 = vmax.f32 %v385_v5, %v391_v34 }
  0xd3   : > { %v471_v38 = vld [vmem:[#allocation2 + $0x37] ss:$2 sm:$0xff]  ;;  %v487_v39 = vld [vmem:[#allocation2 + $0x38] ss:$2 sm:$0xff]  ;;  %v446_v40 = vmax.f32 %v405_v35, %v806_v53  ;;  %463 = vst.msk [vmem:[#allocation2 + $0xa0] sm:$0xff] %vm410_vm2, %v448_v36  ;;  %v450_v43 = vmax.f32 %v409_v37, %v808_v54 }
  0xd4   : > { %v500_v41 = vmax.f32 %v471_v38, %v487_v39  ;;  %v511_v42 = vld [vmem:[#allocation2 + $0x39] ss:$2 sm:$0xff] }
  0xd5   : > { %461 = vst.msk [vmem:[#allocation2 + $0x88] sm:$0xff] %vm410_vm2, %v446_v40 }
  0xd6   : > { %v469_v44 = vld [vmem:[#allocation2 + $0x1f] ss:$2 sm:$0xff]  ;;  %v485_v45 = vld [vmem:[#allocation2 + $0x20] ss:$2 sm:$0xff]  ;;  %v524_v46 = vmax.f32 %v500_v41, %v511_v42  ;;  %465 = vst.msk [vmem:[#allocation2 + $0xb8] sm:$0xff] %vm410_vm2, %v450_v43 }
  0xd7   : > { %v499_v47 = vmax.f32 %v469_v44, %v485_v45  ;;  %v509_v48 = vld [vmem:[#allocation2 + $0x21] ss:$2 sm:$0xff]  ;;  %v489_v50 = vld [vmem:[#allocation2 + $0x50] ss:$2 sm:$0xff]  ;;  %v513_v57 = vld [vmem:[#allocation2 + $0x51] ss:$2 sm:$0xff] }
  0xd8   : > { %v473_v49 = vld [vmem:[#allocation2 + $0x4f] ss:$2 sm:$0xff]  ;;  %532 = vst.msk [vmem:[%s814_s26 + $0x10] sm:$0xff] %vm410_vm2, %v524_v46  ;;  %v491_v52 = vld [vmem:[#allocation2 + $0x68] ss:$2 sm:$0xff] }
  0xd9   : > { %v475_v51 = vld [vmem:[#allocation2 + $0x67] ss:$2 sm:$0xff]  ;;  %v501_v53 = vmax.f32 %v473_v49, %v489_v50  ;;  %v523_v55 = vmax.f32 %v499_v47, %v509_v48 }
  0xda   : > { %v502_v56 = vmax.f32 %v475_v51, %v491_v52  ;;  %v515_v54 = vld [vmem:[#allocation2 + $0x69] ss:$2 sm:$0xff]  ;;  %v495_v61 = vld [vmem:[#allocation2 + $0x98] ss:$2 sm:$0xff]  ;;  %v519_v2 = vld [vmem:[#allocation2 + $0x99] ss:$2 sm:$0xff] }
  0xdb   : > { %v525_v58 = vmax.f32 %v501_v53, %v513_v57  ;;  %531 = vst.msk [vmem:[%s814_s26 + $0x8] sm:$0xff] %vm410_vm2, %v523_v55  ;;  %v479_v60 = vld [vmem:[#allocation2 + $0x97] ss:$2 sm:$0xff] }
  0xdc   : > { %v526_v59 = vmax.f32 %v502_v56, %v515_v54  ;;  %v477_v62 = vld [vmem:[#allocation2 + $0x7f] ss:$2 sm:$0xff]  ;;  %v493_v63 = vld [vmem:[#allocation2 + $0x80] ss:$2 sm:$0xff]  ;;  %v504_v0 = vmax.f32 %v479_v60, %v495_v61 }
  0xdd   : > { %533 = vst.msk [vmem:[%s814_s26 + $0x18] sm:$0xff] %vm410_vm2, %v525_v58  ;;  %v503_v1 = vmax.f32 %v477_v62, %v493_v63  ;;  %v517_v3 = vld [vmem:[#allocation2 + $0x81] ss:$2 sm:$0xff]  ;;  %v497_v7 = vld [vmem:[#allocation2 + $0xb0] ss:$2 sm:$0xff] }
  0xde   : > { %534 = vst.msk [vmem:[%s814_s26 + $0x20] sm:$0xff] %vm410_vm2, %v526_v59  ;;  %v528_v4 = vmax.f32 %v504_v0, %v519_v2  ;;  %v481_v6 = vld [vmem:[#allocation2 + $0xaf] ss:$2 sm:$0xff] }
  0xdf   : > { %v527_v5 = vmax.f32 %v503_v1, %v517_v3  ;;  %v505_v8 = vmax.f32 %v481_v6, %v497_v7  ;;  %v521_v9 = vld [vmem:[#allocation2 + $0xb1] ss:$2 sm:$0xff] }
  0xe0   : > { %536 = vst.msk [vmem:[%s814_s26 + $0x30] sm:$0xff] %vm410_vm2, %v528_v4 }
  0xe1   : > { %535 = vst.msk [vmem:[%s814_s26 + $0x28] sm:$0xff] %vm410_vm2, %v527_v5  ;;  %v529_v10 = vmax.f32 %v505_v8, %v521_v9 }
  0xe3   : > { %537 = vst.msk [vmem:[%s814_s26 + $0x38] sm:$0xff] %vm410_vm2, %v529_v10 }
  0xe4 PF: > { %s12_s9 = sadd.s32 1, %s666_s9  }
  0xe5   : > { %p9_p4 = scmp.ge.s32.totalorder %s12_s9, 4  }
  0xe7   :  { %11 = sbr.rel (!%p9_p4) target bundleno = 1 (0x1), region = 83 }

</bundles_post_ra>
